<compile_context>
chip_gen: v5e
topology: v5e:2x2
jax: 0.10.0
libtpu: 0.0.40
codegen_flags: <defaults>
</compile_context>

<pallas_src>
import math

import jax
import jax.numpy as jnp
from jax.experimental import pallas as pl
from jax.experimental.pallas import tpu as pltpu


_TARGET_BLOCK_BYTES = 2 * 1024 * 1024  # ~2 MiB of x per block


def _build_pos_enc(d_model: int, max_len: int) -> jnp.ndarray:
    """Deterministic sin/cos positional-encoding table (max_len, d_model)."""
    PROGR_END = 10000.0
    pos = jnp.arange(0, max_len, dtype=jnp.float32)[:, None]            # (L, 1)
    div_factor = jnp.exp(
        -1.0 * jnp.arange(0, d_model, 2, dtype=jnp.float32) / d_model
        * math.log(PROGR_END)
    )                                                                   # (ceil(D/2),)
    angles = pos * div_factor                                           # (L, ceil(D/2))
    pe = jnp.zeros((max_len, d_model), dtype=jnp.float32)
    pe = pe.at[:, 0::2].set(jnp.sin(angles))
    # [:, 1::2] has floor(D/2) columns -> trim cos so odd d_model also works.
    pe = pe.at[:, 1::2].set(jnp.cos(angles)[:, : d_model // 2])
    return pe


def _add_pe_kernel(x_ref, pe_ref, o_ref):
    # Works for both paths:
    #   row-tiled : x_ref (TILE_S, D),  pe_ref (TILE_S, D)
    #   flattened : x_ref (B, TILE_F),  pe_ref (1, TILE_F)  (broadcast over B)
    o_ref[...] = (x_ref[...] + pe_ref[...]).astype(o_ref.dtype)


def _pick_row_tile(S: int, D: int, itemsize: int) -> int:
    """Largest multiple-of-8 divisor of S with ~TARGET bytes per (rows, D) tile."""
    rows = max(8, _TARGET_BLOCK_BYTES // (D * itemsize))
    rows = min(S, int(rows))
    rows = max(8, (rows // 8) * 8)
    t = rows
    while t >= 8:
        if S % t == 0:
            return t
        t -= 8
    return S


def _pick_flat_tile(total: int, B: int, itemsize: int) -> int:
    """Largest multiple-of-128 divisor of `total` with ~TARGET bytes per (B, lanes) tile."""
    lanes = max(128, _TARGET_BLOCK_BYTES // (max(1, B) * itemsize))
    lanes = min(total, int(lanes))
    lanes = max(128, (lanes // 128) * 128)
    t = lanes
    while t >= 128:
        if total % t == 0:
            return t
        t -= 128
    return total  # total < 128 (or no aligned divisor): use the full dim


def positional_encoding_forward(x: jnp.ndarray, pos_enc: jnp.ndarray,
                                dropout_p: float = 0.0) -> jnp.ndarray:
    """x: (B, S, D); pos_enc: (max_len, D) float32 table."""
    assert dropout_p == 0.0, "only the inference path (dropout p=0) is implemented"
    # TODO(synk): for p > 0 in training mode, add a pltpu.prng_seed /
    # pltpu.stateful_bernoulli masked-scale path inside the kernel.

    B, S, D = x.shape
    max_len = pos_enc.shape[0]
    assert S <= max_len, f"sequence length {S} exceeds max_len {max_len}"

    pe = pos_enc.astype(x.dtype)           # match activation dtype (bf16-ready)
    itemsize = jnp.dtype(x.dtype).itemsize

    if D % 128 == 0 and S % 8 == 0:
        # --- lane-dense row-tiled path -------------------------------------
        tile_s = _pick_row_tile(S, D, itemsize)
        grid = (S // tile_s, B)  # batch innermost -> PE block stays resident
        out = pl.pallas_call(
            _add_pe_kernel,
            out_shape=jax.ShapeDtypeStruct((B, S, D), x.dtype),
            grid_spec=pltpu.PrefetchScalarGridSpec(
                num_scalar_prefetch=0,
                grid=grid,
                in_specs=[
                    pl.BlockSpec((pl.Squeezed(), tile_s, D),
                                 lambda s, b: (b, s, 0)),
                    # full PE table; BlockSpec windows the rows (no wrapper slice)
                    pl.BlockSpec((tile_s, D), lambda s, b: (s, 0)),
                ],
                out_specs=pl.BlockSpec((pl.Squeezed(), tile_s, D),
                                       lambda s, b: (b, s, 0)),
            ),
            compiler_params=pltpu.CompilerParams(
                dimension_semantics=("parallel", "parallel"),
            ),
        )(x, pe)
        return out

    # --- fallback: flatten (S, D) so the last dim is lane-dense --------------
    total = S * D
    x2 = x.reshape(B, total)
    pe2 = pe[:S, :].reshape(1, total)
    tile_f = _pick_flat_tile(total, B, itemsize)
    grid = (total // tile_f,)
    out = pl.pallas_call(
        _add_pe_kernel,
        out_shape=jax.ShapeDtypeStruct((B, total), x.dtype),
        grid_spec=pltpu.PrefetchScalarGridSpec(
            num_scalar_prefetch=0,
            grid=grid,
            in_specs=[
                pl.BlockSpec((B, tile_f), lambda t: (0, t)),
                pl.BlockSpec((1, tile_f), lambda t: (0, t)),
            ],
            out_specs=pl.BlockSpec((B, tile_f), lambda t: (0, t)),
        ),
        compiler_params=pltpu.CompilerParams(
            dimension_semantics=("parallel",),
        ),
    )(x2, pe2)
    return out.reshape(B, S, D)


if __name__ == "__main__":
    key = jax.random.PRNGKey(0)

    # Case 1: module-style small shapes (d_model=32 -> flattened lane-dense path)
    d_model, max_len, B, S = 32, 512, 2, 8
    pos_enc = _build_pos_enc(d_model, max_len)
    x = jax.random.normal(key, (B, S, d_model), dtype=jnp.float32)
    out = jax.block_until_ready(positional_encoding_forward(x, pos_enc))
    ref = x + pos_enc[:S, :][None, :, :]
    assert out.shape == (B, S, d_model)
    assert jnp.allclose(out, ref, atol=1e-6), "mismatch vs reference (flattened path)"

    # Case 2: lane-aligned shapes exercising the row-tiled path (D=128, S=16)
    d_model2, S2 = 128, 16
    pos_enc2 = _build_pos_enc(d_model2, max_len)
    x2 = jax.random.normal(jax.random.PRNGKey(0), (B, S2, d_model2), dtype=jnp.float32)
    out2 = jax.block_until_ready(positional_encoding_forward(x2, pos_enc2))
    ref2 = x2 + pos_enc2[:S2, :][None, :, :]
    assert out2.shape == (B, S2, d_model2)
    assert jnp.allclose(out2, ref2, atol=1e-6), "mismatch vs reference (row-tiled path)"

    print("KERNEL_OK")
</pallas_src>

<mosaic_0001>
module attributes {stable_mosaic.version = 11 : i64} {
  func.func @_add_pe_kernel(%arg0: i32, %arg1: memref<2x256xf32, #tpu.memory_space<vmem>>, %arg2: memref<1x256xf32, #tpu.memory_space<vmem>>, %arg3: memref<2x256xf32, #tpu.memory_space<vmem>>) attributes {dimension_semantics = [#tpu.dimension_semantics<parallel>], iteration_bounds = array<i64: 1>, scalar_prefetch = 0 : i64, scratch_operands = 0 : i64, tpu.core_type = #tpu.core_type<tc>, window_params = [{transform_indices = @transform_0, window_bounds = array<i64: 2, 256>}, {transform_indices = @transform_1, window_bounds = array<i64: 1, 256>}, {transform_indices = @transform_2, window_bounds = array<i64: 2, 256>}]} {
    %c0 = arith.constant 0 : index
    %c0_0 = arith.constant 0 : index
    %0 = vector.load %arg1[%c0, %c0_0] : memref<2x256xf32, #tpu.memory_space<vmem>>, vector<2x256xf32>
    %c0_1 = arith.constant 0 : index
    %c0_2 = arith.constant 0 : index
    %1 = vector.load %arg2[%c0_1, %c0_2] : memref<1x256xf32, #tpu.memory_space<vmem>>, vector<1x256xf32>
    %2 = vector.broadcast %1 : vector<1x256xf32> to vector<2x256xf32>
    %3 = arith.addf %0, %2 : vector<2x256xf32>
    %c0_3 = arith.constant 0 : index
    %c0_4 = arith.constant 0 : index
    %4 = vector.load %arg3[%c0_3, %c0_4] : memref<2x256xf32, #tpu.memory_space<vmem>>, vector<2x256xf32>
    tpu.vector_store %arg3[%c0_3, %c0_4], %3 {strides = array<i32>} : memref<2x256xf32, #tpu.memory_space<vmem>>, vector<2x256xf32>,
    return
  }
  func.func @transform_0(%arg0: i32) -> (i32, i32) {
    %c0_i32 = arith.constant 0 : i32
    %c0_i32_0 = arith.constant 0 : i32
    return %c0_i32, %arg0 : i32, i32
  }
  func.func @transform_1(%arg0: i32) -> (i32, i32) {
    %c0_i32 = arith.constant 0 : i32
    %c0_i32_0 = arith.constant 0 : i32
    return %c0_i32, %arg0 : i32, i32
  }
  func.func @transform_2(%arg0: i32) -> (i32, i32) {
    %c0_i32 = arith.constant 0 : i32
    %c0_i32_0 = arith.constant 0 : i32
    return %c0_i32, %arg0 : i32, i32
  }
}

</mosaic_0001>

<bundles_post_ra>
// kernel: tpu_custom_call.1
= control target key start
LH: loop header
LB: loop body
LE: loop exit
PB: predicated region body
PF: predicated region fallthrough
CT: control target
= control target key end

     0   :  { %7 = vsyncpa [#allocation3], 0  ;;  %s177_s0 = inlined_call_operand.hbm [shape: f32[2,256], index: 0, kind: input, shape index: {}]   ;;  %s178_s1 = inlined_call_operand.hbm [shape: f32[1,256], index: 1, kind: input, shape index: {}]   ;;  %s179_s2 = inlined_call_operand.hbm [shape: f32[2,256], index: 2, kind: output, shape index: {}]  }
   0x1   :  { %8 = vsyncpa [#allocation6], 0 }
   0x2   :  { %9 = vsyncpa [#allocation4], 0  ;;  %s15_s11 = sshll.u32 %s177_s0, 4  ;;  %s150_s12 = smov [#allocation2]   ;;  %s16_s11 = int_to_ptr.hbm [resolvable:$true] %s15_s11 }
   0x3   :  { %s17_s13 = sshll.u32 %s150_s12, 4  ;;  %s26_s16 = sshll.u32 %s178_s1, 4  ;;  %s18_s13 = int_to_ptr.vmem [resolvable:$true] %s17_s13  ;;  %s27_s16 = int_to_ptr.hbm [resolvable:$true] %s26_s16 }
   0x4   :  { %20 = dma.hbm_to_vmem [thread:$0]  %s16_s11, 64, %s18_s13, [#allocation3]  }
   0x5   :  { %s151_s17 = smov [#allocation5]  }
   0x6   :  { %s28_s18 = sshll.u32 %s151_s17, 4  ;;  %s29_s18 = int_to_ptr.vmem [resolvable:$true] %s28_s18 }
   0x7   :  { %31 = dma.hbm_to_vmem [thread:$0]  %s27_s16, 32, %s29_s18, [#allocation6]  }
   0x8   :  { %144 = dma.done.wait [#allocation3], 64  }
   0x9   :  { %145 = vsyncadd [#allocation3], 4294967232 }
   0xa   :  { %146 = dma.done.wait [#allocation6], 32  }
   0xb   :  { %147 = vsyncadd [#allocation6], 4294967264  ;;  %v41_v0 = vld [vmem:[#allocation5] sm:$0x3]  ;;  %vm46_vm0 = vcmask 1041408   ;;  %s152_s0 = smov [#allocation7]  }
   0xc   :  { %v43_v1 = vperm.slane %v41_v0, 0  ;;  %v44_v2 = vperm.slane %v41_v0, 1  ;;  %v40_v3 = vld [vmem:[#allocation2] sm:$0xf]  ;;  %s56_s19 = sshll.u32 %s152_s0, 4  ;;  %s58_s21 = sshll.u32 %s179_s2, 4  ;;  %s57_s19 = int_to_ptr.vmem [resolvable:$true] %s56_s19  ;;  %s59_s21 = int_to_ptr.hbm [resolvable:$true] %s58_s21 }
   0xe   :  { %v45_v4 = vrot.slane %v44_v2, 6 }
  0x10   :  { %v47_v5 = vsel %vm46_vm0, %v43_v1, %v45_v4 }
  0x11   :  { %v49_v6 = vadd.f32 %v47_v5, %v40_v3 }
  0x13   :  { %50 = vst [vmem:[#allocation7] sm:$0xf] %v49_v6 }
  0x14   :  { %61 = dma.vmem_to_hbm [thread:$0]  %s57_s19, 64, %s59_s21, [#allocation4]  }
  0x15   :  { %148 = dma.done.wait [#allocation4], 64  }
  0x16   :  { %149 = vsyncadd [#allocation4], 4294967232 }
  0x17   :  { %66 = vsyncpa [#allocation3], 1 }
  0x18   :  { %67 = vsyncpa [#allocation6], 1 }
  0x19   :  { %68 = vsyncpa [#allocation4], 1 }

</bundles_post_ra>
